<compile_context>
chip_gen: v7x
topology: tpu7x:2x2x1
jax: 0.10.0
libtpu: 0.0.40
codegen_flags: <defaults>
</compile_context>

<pallas_src>
import functools

import jax
import jax.numpy as jnp
from jax import lax
from jax.experimental import pallas as pl
from jax.experimental.pallas import tpu as pltpu


# ---------------------------------------------------------------------------
# Host-side helpers: align_corners=True bilinear taps / matrices / operators.
# ---------------------------------------------------------------------------
def interp_taps(out_size, in_size):
    """Per-output (lo, hi, frac) 2-tap weights for align_corners=True."""
    if in_size == 1:
        return [(0, 0, 0.0) for _ in range(out_size)]
    if out_size == 1:
        return [(0, 1, 0.0)]
    step = (in_size - 1) / (out_size - 1)
    taps = []
    for o in range(out_size):
        pos = o * step
        lo = min(int(pos), in_size - 2)
        taps.append((lo, lo + 1, float(pos - lo)))
    return taps


def interp_matrix(out_size, in_size, dtype=jnp.float32):
    rows = []
    for lo, hi, frac in interp_taps(out_size, in_size):
        row = [0.0] * in_size
        row[lo] += 1.0 - frac
        row[hi] += frac
        rows.append(row)
    return jnp.array(rows, dtype)


def _banded_conv_operand(w_hwio, wi):
    """(Wi*Cin, 3*Wi*Cout): per-dy banded conv-along-W operators concatenated
    along columns.  W-direction zero padding is implicit (missing bands).
    Host-side, built once at init.  Viable for small C only (see TODO above)."""
    cin, cout = w_hwio.shape[2], w_hwio.shape[3]
    mats = []
    for dy in range(3):
        m = jnp.zeros((wi * cin, wi * cout), jnp.float32)
        for dx in range(3):
            band = jnp.eye(wi, k=1 - dx, dtype=jnp.float32)   # wi_in = wo + dx - 1
            m = m + jnp.kron(band, w_hwio[dy, dx].astype(jnp.float32))
        mats.append(m)
    return jnp.concatenate(mats, axis=1)


def _h_operator_stack(a):
    """(3, Ho, Hi): H-upsample matrix composed with the conv row shift for each
    dy tap; H-direction zero padding is folded in (dropped edge columns)."""
    ho, hi = a.shape
    if hi == 1:
        a0 = jnp.zeros_like(a)
        a2 = jnp.zeros_like(a)
    else:
        z = jnp.zeros((ho, 1), a.dtype)
        a0 = jnp.concatenate([a[:, 1:], z], axis=1)    # dy=0 uses input row h-1
        a2 = jnp.concatenate([z, a[:, :-1]], axis=1)   # dy=2 uses input row h+1
    return jnp.stack([a0, a, a2], axis=0)


# ---------------------------------------------------------------------------
# Fused kernel: all branches, f32 accumulator, one HBM write per batch element.
# ---------------------------------------------------------------------------
def _fusion_kernel(*refs, plan, cout, ho, wo, compute_dtype):
    o_ref = refs[-1]
    acc = jnp.zeros((ho, wo * cout), jnp.float32)
    pos = 0
    for br in plan:
        wi_i, scale = br["Wi"], br["scale"]
        wc = wi_i * cout
        x_ref, wcat_ref, a_ref = refs[pos], refs[pos + 1], refs[pos + 2]
        pos += 3
        if scale != 1:
            wup_ref = refs[pos]
            pos += 1

        x = x_ref[0]                                          # (Hi, Wi*Cin)
        # conv3x3 along W for the three row taps, as ONE matmul against the
        # banded operand; result is already in the lane-dense slab layout.
        t = jnp.dot(x, wcat_ref[...],
                    preferred_element_type=jnp.float32)       # (Hi, 3*Wi*Cout)
        t = t.astype(compute_dtype)

        # H zero pad + row taps + H upsample via three tiny (Ho, Hi) matmuls.
        u = jnp.zeros((ho, wc), jnp.float32)
        for dy in range(3):
            u = u + jnp.dot(a_ref[dy], t[:, dy * wc:(dy + 1) * wc],
                            preferred_element_type=jnp.float32)

        if scale != 1:
            # Sparse 2-tap W upsample: static lane gather + VPU weighted add
            # (no dense kron(B^T, I_C) operand, no extra MXU FLOPs).
            g0 = jnp.concatenate(
                [u[:, l * cout:(l + 1) * cout] for l in br["lo"]], axis=-1)
            g1 = jnp.concatenate(
                [u[:, h * cout:(h + 1) * cout] for h in br["hi"]], axis=-1)
            u = wup_ref[0:1, :] * g0 + wup_ref[1:2, :] * g1   # (Ho, Wo*Cout)

        acc = acc + u
    o_ref[...] = acc[None].astype(o_ref.dtype)


def multi_resolution_fusion(xs_nchw, branches, cout, max_size, compute_dtype):
    n = xs_nchw[0].shape[0]
    ho = wo = max_size
    out_dtype = xs_nchw[0].dtype

    args, in_specs, plan = [], [], []
    flops = 0
    bytes_accessed = 0
    for x, br in zip(xs_nchw, branches):
        hi_i, wi_i, cin, scale = br["Hi"], br["Wi"], br["Cin"], br["scale"]
        # TODO(synk): keep activations in the NHWC / (H, W*C) slab layout
        # end-to-end across the network so these XLA-side transposes disappear.
        x_slab = jnp.transpose(x, (0, 2, 3, 1)).reshape(n, hi_i, wi_i * cin)
        x_slab = x_slab.astype(compute_dtype)

        args += [x_slab, br["wcat"], br["a"]]
        in_specs += [
            pl.BlockSpec((1, hi_i, wi_i * cin), lambda i: (i, 0, 0)),
            # TODO(synk): pipeline_mode=pl.Buffered(1) on these grid-invariant
            # operands (or hoist them) to reclaim double-buffer VMEM on v7x.
            pl.BlockSpec(br["wcat"].shape, lambda i: (0, 0)),
            pl.BlockSpec(br["a"].shape, lambda i: (0, 0, 0)),
        ]
        if scale != 1:
            args.append(br["wup"])
            in_specs.append(pl.BlockSpec(br["wup"].shape, lambda i: (0, 0)))
        plan.append(dict(Wi=wi_i, scale=scale, lo=br["lo"], hi=br["hi"]))

        wc = wi_i * cout
        flops += 2 * n * hi_i * (wi_i * cin) * (3 * wc)       # banded conv matmul
        flops += 2 * n * 3 * ho * hi_i * wc                   # H taps + upsample
        if scale != 1:
            flops += 3 * n * ho * wo * cout                   # 2-tap W upsample
        for arr in (x_slab, br["wcat"], br["a"]):
            bytes_accessed += arr.size * arr.dtype.itemsize
        if scale != 1:
            bytes_accessed += br["wup"].size * br["wup"].dtype.itemsize
    bytes_accessed += n * ho * wo * cout * jnp.dtype(out_dtype).itemsize

    kernel = functools.partial(_fusion_kernel, plan=tuple(plan), cout=cout,
                               ho=ho, wo=wo, compute_dtype=compute_dtype)
    return pl.pallas_call(
        kernel,
        out_shape=jax.ShapeDtypeStruct((n, ho, wo * cout), out_dtype),
        grid=(n,),
        in_specs=in_specs,
        out_specs=pl.BlockSpec((1, ho, wo * cout), lambda i: (i, 0, 0)),
        compiler_params=pltpu.CompilerParams(
            dimension_semantics=("parallel",),
            # Explicit scoped-VMEM budget (safe on v7x's 64 MiB physical VMEM;
            # raise towards ~100 MiB on v5e/v6e when H-strip tiling lands).
            vmem_limit_bytes=48 * 1024 * 1024,
        ),
        cost_estimate=pl.CostEstimate(flops=int(flops), transcendentals=0,
                                      bytes_accessed=int(bytes_accessed)),
    )(*args)


# ---------------------------------------------------------------------------
# Module wrapper (PyTorch-compatible NCHW interface).
# ---------------------------------------------------------------------------
class MutiResolutionFusionPallas:
    def __init__(self, oup_ch, *dim_of_features, key, compute_dtype=jnp.float32):
        # compute_dtype: MXU operand dtype.  Use jnp.bfloat16 on v6e/v7x for
        # ~2x MXU throughput and half the VMEM/HBM footprint; accumulation and
        # the cross-branch sum stay f32 either way.
        self.oup_ch = oup_ch
        self.compute_dtype = compute_dtype
        _, max_size = max(dim_of_features, key=lambda x: x[1])
        self.max_size = max_size
        self.scale_factors = []
        self.weights_hwio = []            # (3,3,Cin,Cout) for the reference
        self.branches = []
        keys = jax.random.split(key, len(dim_of_features))
        for i, (inp_ch, inp_size) in enumerate(dim_of_features):
            assert max_size % inp_size == 0, f"max_size not divisible by dim {i}"
            scale = max_size // inp_size
            self.scale_factors.append(scale)
            fan_in = inp_ch * 9
            bound = (1.0 / fan_in) ** 0.5
            w = jax.random.uniform(keys[i], (3, 3, inp_ch, oup_ch),
                                   jnp.float32, -bound, bound)
            self.weights_hwio.append(w)

            hi_i = wi_i = inp_size
            ho = wo = max_size
            taps_w = interp_taps(wo, wi_i)
            br = dict(
                Hi=hi_i, Wi=wi_i, Cin=inp_ch, scale=scale,
                wcat=_banded_conv_operand(w, wi_i).astype(compute_dtype),
                a=_h_operator_stack(interp_matrix(ho, hi_i)).astype(compute_dtype),
                lo=tuple(t[0] for t in taps_w),
                hi=tuple(t[1] for t in taps_w),
            )
            if scale != 1:
                w0, w1 = [], []
                for lo, hi, frac in taps_w:
                    w0.extend([1.0 - frac] * oup_ch)
                    w1.extend([frac] * oup_ch)
                br["wup"] = jnp.array([w0, w1], jnp.float32)
            self.branches.append(br)

    def __call__(self, *xs_nchw):
        n = xs_nchw[0].shape[0]
        out_slab = multi_resolution_fusion(xs_nchw, self.branches, self.oup_ch,
                                           self.max_size, self.compute_dtype)
        out = out_slab.reshape(n, self.max_size, self.max_size, self.oup_ch)
        return jnp.transpose(out, (0, 3, 1, 2))                 # NHWC -> NCHW


# ---------------------------------------------------------------------------
# Pure-JAX reference (correctness checking only).
# ---------------------------------------------------------------------------
def reference_forward(module, *xs_nchw):
    out = None
    for i, x in enumerate(xs_nchw):
        x_nhwc = jnp.transpose(x, (0, 2, 3, 1))
        y = lax.conv_general_dilated(
            x_nhwc, module.weights_hwio[i], window_strides=(1, 1),
            padding=((1, 1), (1, 1)),
            dimension_numbers=("NHWC", "HWIO", "NHWC"))
        s = module.scale_factors[i]
        if s != 1:
            hi_i, wi_i = y.shape[1], y.shape[2]
            a = interp_matrix(hi_i * s, hi_i)
            b = interp_matrix(wi_i * s, wi_i)
            y = jnp.einsum("oh,nhwc->nowc", a, y)
            y = jnp.einsum("pw,nowc->nopc", b, y)
        out = y if out is None else out + y
    return jnp.transpose(out, (0, 3, 1, 2))


if __name__ == "__main__":
    key = jax.random.PRNGKey(0)
    k_w, k_x0, k_x1 = jax.random.split(key, 3)

    # Two feature maps: (C=4, size=16) and (C=8, size=8), oup_ch=4, batch=2.
    oup_ch = 4
    dims = ((4, 16), (8, 8))
    module = MutiResolutionFusionPallas(oup_ch, *dims, key=k_w)

    x0 = jax.random.normal(k_x0, (2, 4, 16, 16), jnp.float32)   # NCHW
    x1 = jax.random.normal(k_x1, (2, 8, 8, 8), jnp.float32)     # NCHW

    fwd = jax.jit(lambda a, b: module(a, b))
    out = jax.block_until_ready(fwd(x0, x1))

    ref = jax.block_until_ready(reference_forward(module, x0, x1))
    assert out.shape == (2, oup_ch, 16, 16), out.shape
    err = float(jnp.max(jnp.abs(out - ref)))
    assert jnp.allclose(out, ref, rtol=1e-4, atol=1e-4), err

    print("KERNEL_OK")
</pallas_src>

<mosaic_0001>
module attributes {stable_mosaic.version = 11 : i64} {
  func.func @_fusion_kernel(%arg0: i32, %arg1: memref<1x16x64xf32, #tpu.memory_space<vmem>>, %arg2: memref<64x192xf32, #tpu.memory_space<vmem>>, %arg3: memref<3x16x16xf32, #tpu.memory_space<vmem>>, %arg4: memref<1x8x64xf32, #tpu.memory_space<vmem>>, %arg5: memref<64x96xf32, #tpu.memory_space<vmem>>, %arg6: memref<3x16x8xf32, #tpu.memory_space<vmem>>, %arg7: memref<2x64xf32, #tpu.memory_space<vmem>>, %arg8: memref<1x16x64xf32, #tpu.memory_space<vmem>>) attributes {dimension_semantics = [#tpu.dimension_semantics<parallel>], iteration_bounds = array<i64: 2>, scalar_prefetch = 0 : i64, scratch_operands = 0 : i64, tpu.core_type = #tpu.core_type<tc>, window_params = [{transform_indices = @transform_0, window_bounds = array<i64: 1, 16, 64>}, {pipeline_mode = #tpu.pipeline_mode<synchronous>, transform_indices = @transform_1, window_bounds = array<i64: 64, 192>}, {pipeline_mode = #tpu.pipeline_mode<synchronous>, transform_indices = @transform_2, window_bounds = array<i64: 3, 16, 16>}, {transform_indices = @transform_3, window_bounds = array<i64: 1, 8, 64>}, {pipeline_mode = #tpu.pipeline_mode<synchronous>, transform_indices = @transform_4, window_bounds = array<i64: 64, 96>}, {pipeline_mode = #tpu.pipeline_mode<synchronous>, transform_indices = @transform_5, window_bounds = array<i64: 3, 16, 8>}, {pipeline_mode = #tpu.pipeline_mode<synchronous>, transform_indices = @transform_6, window_bounds = array<i64: 2, 64>}, {transform_indices = @transform_7, window_bounds = array<i64: 1, 16, 64>}]} {
    %cst = arith.constant 0.000000e+00 : f32
    %0 = vector.broadcast %cst : f32 to vector<16x64xf32>
    %c0 = arith.constant 0 : index
    %c0_0 = arith.constant 0 : index
    %c0_1 = arith.constant 0 : index
    %1 = vector.load %arg1[%c0, %c0_0, %c0_1] : memref<1x16x64xf32, #tpu.memory_space<vmem>>, vector<1x16x64xf32>
    %2 = vector.shape_cast %1 : vector<1x16x64xf32> to vector<16x64xf32>
    %c0_2 = arith.constant 0 : index
    %c0_3 = arith.constant 0 : index
    %3 = vector.load %arg2[%c0_2, %c0_3] : memref<64x192xf32, #tpu.memory_space<vmem>>, vector<64x192xf32>
    %cst_4 = arith.constant dense<0.000000e+00> : vector<16x192xf32>
    %4 = tpu.matmul %2, %3, %cst_4 {dimension_numbers = #tpu.dot_dimension_numbers<[1], [0], [0], [1], [0, 0, 1, 1], [], []>} : vector<16x64xf32>, vector<64x192xf32>, vector<16x192xf32> -> vector<16x192xf32>
    %cst_5 = arith.constant 0.000000e+00 : f32
    %5 = vector.broadcast %cst_5 : f32 to vector<16x64xf32>
    %c0_6 = arith.constant 0 : index
    %c0_7 = arith.constant 0 : index
    %c0_8 = arith.constant 0 : index
    %6 = vector.load %arg3[%c0_6, %c0_7, %c0_8] : memref<3x16x16xf32, #tpu.memory_space<vmem>>, vector<1x16x16xf32>
    %7 = vector.shape_cast %6 : vector<1x16x16xf32> to vector<16x16xf32>
    %8 = vector.extract_strided_slice %4 {offsets = [0, 0], sizes = [16, 64], strides = [1, 1]} : vector<16x192xf32> to vector<16x64xf32>
    %cst_9 = arith.constant dense<0.000000e+00> : vector<16x64xf32>
    %9 = tpu.matmul %7, %8, %cst_9 {dimension_numbers = #tpu.dot_dimension_numbers<[1], [0], [0], [1], [0, 0, 1, 1], [], []>} : vector<16x16xf32>, vector<16x64xf32>, vector<16x64xf32> -> vector<16x64xf32>
    %10 = arith.addf %5, %9 : vector<16x64xf32>
    %c1 = arith.constant 1 : index
    %c0_10 = arith.constant 0 : index
    %c0_11 = arith.constant 0 : index
    %11 = vector.load %arg3[%c1, %c0_10, %c0_11] : memref<3x16x16xf32, #tpu.memory_space<vmem>>, vector<1x16x16xf32>
    %12 = vector.shape_cast %11 : vector<1x16x16xf32> to vector<16x16xf32>
    %13 = vector.extract_strided_slice %4 {offsets = [0, 64], sizes = [16, 64], strides = [1, 1]} : vector<16x192xf32> to vector<16x64xf32>
    %cst_12 = arith.constant dense<0.000000e+00> : vector<16x64xf32>
    %14 = tpu.matmul %12, %13, %cst_12 {dimension_numbers = #tpu.dot_dimension_numbers<[1], [0], [0], [1], [0, 0, 1, 1], [], []>} : vector<16x16xf32>, vector<16x64xf32>, vector<16x64xf32> -> vector<16x64xf32>
    %15 = arith.addf %10, %14 : vector<16x64xf32>
    %c2 = arith.constant 2 : index
    %c0_13 = arith.constant 0 : index
    %c0_14 = arith.constant 0 : index
    %16 = vector.load %arg3[%c2, %c0_13, %c0_14] : memref<3x16x16xf32, #tpu.memory_space<vmem>>, vector<1x16x16xf32>
    %17 = vector.shape_cast %16 : vector<1x16x16xf32> to vector<16x16xf32>
    %18 = vector.extract_strided_slice %4 {offsets = [0, 128], sizes = [16, 64], strides = [1, 1]} : vector<16x192xf32> to vector<16x64xf32>
    %cst_15 = arith.constant dense<0.000000e+00> : vector<16x64xf32>
    %19 = tpu.matmul %17, %18, %cst_15 {dimension_numbers = #tpu.dot_dimension_numbers<[1], [0], [0], [1], [0, 0, 1, 1], [], []>} : vector<16x16xf32>, vector<16x64xf32>, vector<16x64xf32> -> vector<16x64xf32>
    %20 = arith.addf %15, %19 : vector<16x64xf32>
    %21 = arith.addf %0, %20 : vector<16x64xf32>
    %c0_16 = arith.constant 0 : index
    %c0_17 = arith.constant 0 : index
    %c0_18 = arith.constant 0 : index
    %22 = vector.load %arg4[%c0_16, %c0_17, %c0_18] : memref<1x8x64xf32, #tpu.memory_space<vmem>>, vector<1x8x64xf32>
    %23 = vector.shape_cast %22 : vector<1x8x64xf32> to vector<8x64xf32>
    %c0_19 = arith.constant 0 : index
    %c0_20 = arith.constant 0 : index
    %24 = vector.load %arg5[%c0_19, %c0_20] : memref<64x96xf32, #tpu.memory_space<vmem>>, vector<64x96xf32>
    %cst_21 = arith.constant dense<0.000000e+00> : vector<8x96xf32>
    %25 = tpu.matmul %23, %24, %cst_21 {dimension_numbers = #tpu.dot_dimension_numbers<[1], [0], [0], [1], [0, 0, 1, 1], [], []>} : vector<8x64xf32>, vector<64x96xf32>, vector<8x96xf32> -> vector<8x96xf32>
    %cst_22 = arith.constant 0.000000e+00 : f32
    %26 = vector.broadcast %cst_22 : f32 to vector<16x32xf32>
    %c0_23 = arith.constant 0 : index
    %c0_24 = arith.constant 0 : index
    %c0_25 = arith.constant 0 : index
    %27 = vector.load %arg6[%c0_23, %c0_24, %c0_25] : memref<3x16x8xf32, #tpu.memory_space<vmem>>, vector<1x16x8xf32>
    %28 = vector.shape_cast %27 : vector<1x16x8xf32> to vector<16x8xf32>
    %29 = vector.extract_strided_slice %25 {offsets = [0, 0], sizes = [8, 32], strides = [1, 1]} : vector<8x96xf32> to vector<8x32xf32>
    %cst_26 = arith.constant dense<0.000000e+00> : vector<16x32xf32>
    %30 = tpu.matmul %28, %29, %cst_26 {dimension_numbers = #tpu.dot_dimension_numbers<[1], [0], [0], [1], [0, 0, 1, 1], [], []>} : vector<16x8xf32>, vector<8x32xf32>, vector<16x32xf32> -> vector<16x32xf32>
    %31 = arith.addf %26, %30 : vector<16x32xf32>
    %c1_27 = arith.constant 1 : index
    %c0_28 = arith.constant 0 : index
    %c0_29 = arith.constant 0 : index
    %32 = vector.load %arg6[%c1_27, %c0_28, %c0_29] : memref<3x16x8xf32, #tpu.memory_space<vmem>>, vector<1x16x8xf32>
    %33 = vector.shape_cast %32 : vector<1x16x8xf32> to vector<16x8xf32>
    %34 = vector.extract_strided_slice %25 {offsets = [0, 32], sizes = [8, 32], strides = [1, 1]} : vector<8x96xf32> to vector<8x32xf32>
    %cst_30 = arith.constant dense<0.000000e+00> : vector<16x32xf32>
    %35 = tpu.matmul %33, %34, %cst_30 {dimension_numbers = #tpu.dot_dimension_numbers<[1], [0], [0], [1], [0, 0, 1, 1], [], []>} : vector<16x8xf32>, vector<8x32xf32>, vector<16x32xf32> -> vector<16x32xf32>
    %36 = arith.addf %31, %35 : vector<16x32xf32>
    %c2_31 = arith.constant 2 : index
    %c0_32 = arith.constant 0 : index
    %c0_33 = arith.constant 0 : index
    %37 = vector.load %arg6[%c2_31, %c0_32, %c0_33] : memref<3x16x8xf32, #tpu.memory_space<vmem>>, vector<1x16x8xf32>
    %38 = vector.shape_cast %37 : vector<1x16x8xf32> to vector<16x8xf32>
    %39 = vector.extract_strided_slice %25 {offsets = [0, 64], sizes = [8, 32], strides = [1, 1]} : vector<8x96xf32> to vector<8x32xf32>
    %cst_34 = arith.constant dense<0.000000e+00> : vector<16x32xf32>
    %40 = tpu.matmul %38, %39, %cst_34 {dimension_numbers = #tpu.dot_dimension_numbers<[1], [0], [0], [1], [0, 0, 1, 1], [], []>} : vector<16x8xf32>, vector<8x32xf32>, vector<16x32xf32> -> vector<16x32xf32>
    %41 = arith.addf %36, %40 : vector<16x32xf32>
    %42 = vector.extract_strided_slice %41 {offsets = [0, 0], sizes = [16, 4], strides = [1, 1]} : vector<16x32xf32> to vector<16x4xf32>
    %43 = vector.extract_strided_slice %41 {offsets = [0, 0], sizes = [16, 4], strides = [1, 1]} : vector<16x32xf32> to vector<16x4xf32>
    %44 = vector.extract_strided_slice %41 {offsets = [0, 0], sizes = [16, 4], strides = [1, 1]} : vector<16x32xf32> to vector<16x4xf32>
    %45 = vector.extract_strided_slice %41 {offsets = [0, 4], sizes = [16, 4], strides = [1, 1]} : vector<16x32xf32> to vector<16x4xf32>
    %46 = vector.extract_strided_slice %41 {offsets = [0, 4], sizes = [16, 4], strides = [1, 1]} : vector<16x32xf32> to vector<16x4xf32>
    %47 = vector.extract_strided_slice %41 {offsets = [0, 8], sizes = [16, 4], strides = [1, 1]} : vector<16x32xf32> to vector<16x4xf32>
    %48 = vector.extract_strided_slice %41 {offsets = [0, 8], sizes = [16, 4], strides = [1, 1]} : vector<16x32xf32> to vector<16x4xf32>
    %49 = vector.extract_strided_slice %41 {offsets = [0, 12], sizes = [16, 4], strides = [1, 1]} : vector<16x32xf32> to vector<16x4xf32>
    %50 = vector.extract_strided_slice %41 {offsets = [0, 12], sizes = [16, 4], strides = [1, 1]} : vector<16x32xf32> to vector<16x4xf32>
    %51 = vector.extract_strided_slice %41 {offsets = [0, 16], sizes = [16, 4], strides = [1, 1]} : vector<16x32xf32> to vector<16x4xf32>
    %52 = vector.extract_strided_slice %41 {offsets = [0, 16], sizes = [16, 4], strides = [1, 1]} : vector<16x32xf32> to vector<16x4xf32>
    %53 = vector.extract_strided_slice %41 {offsets = [0, 20], sizes = [16, 4], strides = [1, 1]} : vector<16x32xf32> to vector<16x4xf32>
    %54 = vector.extract_strided_slice %41 {offsets = [0, 20], sizes = [16, 4], strides = [1, 1]} : vector<16x32xf32> to vector<16x4xf32>
    %55 = vector.extract_strided_slice %41 {offsets = [0, 24], sizes = [16, 4], strides = [1, 1]} : vector<16x32xf32> to vector<16x4xf32>
    %56 = vector.extract_strided_slice %41 {offsets = [0, 24], sizes = [16, 4], strides = [1, 1]} : vector<16x32xf32> to vector<16x4xf32>
    %57 = vector.extract_strided_slice %41 {offsets = [0, 24], sizes = [16, 4], strides = [1, 1]} : vector<16x32xf32> to vector<16x4xf32>
    %58 = tpu.concatenate %42, %43, %44, %45, %46, %47, %48, %49, %50, %51, %52, %53, %54, %55, %56, %57 in 1 : vector<16x4xf32>, vector<16x4xf32>, vector<16x4xf32>, vector<16x4xf32>, vector<16x4xf32>, vector<16x4xf32>, vector<16x4xf32>, vector<16x4xf32>, vector<16x4xf32>, vector<16x4xf32>, vector<16x4xf32>, vector<16x4xf32>, vector<16x4xf32>, vector<16x4xf32>, vector<16x4xf32>, vector<16x4xf32> -> vector<16x64xf32>
    %59 = vector.extract_strided_slice %41 {offsets = [0, 4], sizes = [16, 4], strides = [1, 1]} : vector<16x32xf32> to vector<16x4xf32>
    %60 = vector.extract_strided_slice %41 {offsets = [0, 4], sizes = [16, 4], strides = [1, 1]} : vector<16x32xf32> to vector<16x4xf32>
    %61 = vector.extract_strided_slice %41 {offsets = [0, 4], sizes = [16, 4], strides = [1, 1]} : vector<16x32xf32> to vector<16x4xf32>
    %62 = vector.extract_strided_slice %41 {offsets = [0, 8], sizes = [16, 4], strides = [1, 1]} : vector<16x32xf32> to vector<16x4xf32>
    %63 = vector.extract_strided_slice %41 {offsets = [0, 8], sizes = [16, 4], strides = [1, 1]} : vector<16x32xf32> to vector<16x4xf32>
    %64 = vector.extract_strided_slice %41 {offsets = [0, 12], sizes = [16, 4], strides = [1, 1]} : vector<16x32xf32> to vector<16x4xf32>
    %65 = vector.extract_strided_slice %41 {offsets = [0, 12], sizes = [16, 4], strides = [1, 1]} : vector<16x32xf32> to vector<16x4xf32>
    %66 = vector.extract_strided_slice %41 {offsets = [0, 16], sizes = [16, 4], strides = [1, 1]} : vector<16x32xf32> to vector<16x4xf32>
    %67 = vector.extract_strided_slice %41 {offsets = [0, 16], sizes = [16, 4], strides = [1, 1]} : vector<16x32xf32> to vector<16x4xf32>
    %68 = vector.extract_strided_slice %41 {offsets = [0, 20], sizes = [16, 4], strides = [1, 1]} : vector<16x32xf32> to vector<16x4xf32>
    %69 = vector.extract_strided_slice %41 {offsets = [0, 20], sizes = [16, 4], strides = [1, 1]} : vector<16x32xf32> to vector<16x4xf32>
    %70 = vector.extract_strided_slice %41 {offsets = [0, 24], sizes = [16, 4], strides = [1, 1]} : vector<16x32xf32> to vector<16x4xf32>
    %71 = vector.extract_strided_slice %41 {offsets = [0, 24], sizes = [16, 4], strides = [1, 1]} : vector<16x32xf32> to vector<16x4xf32>
    %72 = vector.extract_strided_slice %41 {offsets = [0, 28], sizes = [16, 4], strides = [1, 1]} : vector<16x32xf32> to vector<16x4xf32>
    %73 = vector.extract_strided_slice %41 {offsets = [0, 28], sizes = [16, 4], strides = [1, 1]} : vector<16x32xf32> to vector<16x4xf32>
    %74 = vector.extract_strided_slice %41 {offsets = [0, 28], sizes = [16, 4], strides = [1, 1]} : vector<16x32xf32> to vector<16x4xf32>
    %75 = tpu.concatenate %59, %60, %61, %62, %63, %64, %65, %66, %67, %68, %69, %70, %71, %72, %73, %74 in 1 : vector<16x4xf32>, vector<16x4xf32>, vector<16x4xf32>, vector<16x4xf32>, vector<16x4xf32>, vector<16x4xf32>, vector<16x4xf32>, vector<16x4xf32>, vector<16x4xf32>, vector<16x4xf32>, vector<16x4xf32>, vector<16x4xf32>, vector<16x4xf32>, vector<16x4xf32>, vector<16x4xf32>, vector<16x4xf32> -> vector<16x64xf32>
    %c0_35 = arith.constant 0 : index
    %c0_36 = arith.constant 0 : index
    %76 = vector.load %arg7[%c0_35, %c0_36] : memref<2x64xf32, #tpu.memory_space<vmem>>, vector<1x64xf32>
    %77 = vector.broadcast %76 : vector<1x64xf32> to vector<16x64xf32>
    %78 = arith.mulf %77, %58 : vector<16x64xf32>
    %c1_37 = arith.constant 1 : index
    %c0_38 = arith.constant 0 : index
    %79 = vector.load %arg7[%c1_37, %c0_38] : memref<2x64xf32, #tpu.memory_space<vmem>>, vector<1x64xf32>
    %80 = vector.broadcast %79 : vector<1x64xf32> to vector<16x64xf32>
    %81 = arith.mulf %80, %75 : vector<16x64xf32>
    %82 = arith.addf %78, %81 : vector<16x64xf32>
    %83 = arith.addf %21, %82 : vector<16x64xf32>
    %84 = vector.shape_cast %83 : vector<16x64xf32> to vector<1x16x64xf32>
    %c0_39 = arith.constant 0 : index
    %c0_40 = arith.constant 0 : index
    %c0_41 = arith.constant 0 : index
    %85 = vector.load %arg8[%c0_39, %c0_40, %c0_41] : memref<1x16x64xf32, #tpu.memory_space<vmem>>, vector<1x16x64xf32>
    tpu.vector_store %arg8[%c0_39, %c0_40, %c0_41], %84 {strides = array<i32>} : memref<1x16x64xf32, #tpu.memory_space<vmem>>, vector<1x16x64xf32>,
    return
  }
  func.func @transform_0(%arg0: i32) -> (i32, i32, i32) {
    %c0_i32 = arith.constant 0 : i32
    %c0_i32_0 = arith.constant 0 : i32
    %c0_i32_1 = arith.constant 0 : i32
    return %arg0, %c0_i32, %c0_i32_0 : i32, i32, i32
  }
  func.func @transform_1(%arg0: i32) -> (i32, i32) {
    %c0_i32 = arith.constant 0 : i32
    %c0_i32_0 = arith.constant 0 : i32
    %c0_i32_1 = arith.constant 0 : i32
    return %c0_i32, %c0_i32_0 : i32, i32
  }
  func.func @transform_2(%arg0: i32) -> (i32, i32, i32) {
    %c0_i32 = arith.constant 0 : i32
    %c0_i32_0 = arith.constant 0 : i32
    %c0_i32_1 = arith.constant 0 : i32
    %c0_i32_2 = arith.constant 0 : i32
    return %c0_i32, %c0_i32_0, %c0_i32_1 : i32, i32, i32
  }
  func.func @transform_3(%arg0: i32) -> (i32, i32, i32) {
    %c0_i32 = arith.constant 0 : i32
    %c0_i32_0 = arith.constant 0 : i32
    %c0_i32_1 = arith.constant 0 : i32
    return %arg0, %c0_i32, %c0_i32_0 : i32, i32, i32
  }
  func.func @transform_4(%arg0: i32) -> (i32, i32) {
    %c0_i32 = arith.constant 0 : i32
    %c0_i32_0 = arith.constant 0 : i32
    %c0_i32_1 = arith.constant 0 : i32
    return %c0_i32, %c0_i32_0 : i32, i32
  }
  func.func @transform_5(%arg0: i32) -> (i32, i32, i32) {
    %c0_i32 = arith.constant 0 : i32
    %c0_i32_0 = arith.constant 0 : i32
    %c0_i32_1 = arith.constant 0 : i32
    %c0_i32_2 = arith.constant 0 : i32
    return %c0_i32, %c0_i32_0, %c0_i32_1 : i32, i32, i32
  }
  func.func @transform_6(%arg0: i32) -> (i32, i32) {
    %c0_i32 = arith.constant 0 : i32
    %c0_i32_0 = arith.constant 0 : i32
    %c0_i32_1 = arith.constant 0 : i32
    return %c0_i32, %c0_i32_0 : i32, i32
  }
  func.func @transform_7(%arg0: i32) -> (i32, i32, i32) {
    %c0_i32 = arith.constant 0 : i32
    %c0_i32_0 = arith.constant 0 : i32
    %c0_i32_1 = arith.constant 0 : i32
    return %arg0, %c0_i32, %c0_i32_0 : i32, i32, i32
  }
}

</mosaic_0001>

<bundles_post_ra>
// kernel: _lambda_.1
= control target key start
LH: loop header
LB: loop body
LE: loop exit
PB: predicated region body
PF: predicated region fallthrough
CT: control target
= control target key end

     0   :  { %s1490_s24 = smov 0   ;;  %s1720_s0 = inlined_call_operand.vmem [shape: f32[2,16,64], index: 0, kind: input, shape index: {}]   ;;  %s1721_s1 = inlined_call_operand.vmem [shape: f32[64,192], index: 1, kind: input, shape index: {}]   ;;  %s1722_s2 = inlined_call_operand.vmem [shape: f32[3,16,16], index: 2, kind: input, shape index: {}]   ;;  %s1723_s3 = inlined_call_operand.vmem [shape: f32[2,8,64], index: 3, kind: input, shape index: {}]   ;;  %s1724_s4 = inlined_call_operand.vmem [shape: f32[64,96], index: 4, kind: input, shape index: {}]   ;;  %s1725_s5 = inlined_call_operand.vmem [shape: f32[3,16,8], index: 5, kind: input, shape index: {}]   ;;  %s1726_s6 = inlined_call_operand.vmem [shape: f32[2,64], index: 6, kind: input, shape index: {}]   ;;  %s1727_s7 = inlined_call_operand.vmem [shape: f32[2,16,64], index: 7, kind: output, shape index: {}]  }
   0x1 LB: > { %s1227_s25 = sadd.s32 4294967295, %s1433_s24   ;;  %p1231_p0 = scmp.ge.s32.totalorder %s1433_s24, 1  ;;  %s1433_s24 = sphi %s1490_s24, %s17_s24  }
   0x2   : > { %p246_p1 = scmp.lt.s32.totalorder %s1433_s24, 3 }
   0x4   : > { %p247_p2 = pnand %p1231_p0, %p246_p1 }
   0x5   : > { %v299_v0 = vld [vmem:[%s1721_s1 + $0x8] sm:$0xff] (!%p247_p2)  ;;  %v301_v1 = vld [vmem:[%s1721_s1 + $0x18] sm:$0xff] (!%p247_p2)  ;;  %v298_v2 = vld [vmem:[%s1721_s1] sm:$0xff] (!%p247_p2)  ;;  %v1435_v7 = vmov (!%p247_p2), 0.0   ;;  %p282_p3 = scmp.lt.s32.totalorder (!%p247_p2), %s1227_s25, 1  ;;  %vm314_vm0 = vcmask (!%p247_p2), 523264  }
   0x6   : > { %250 = sbr.rel (%p247_p2) target bundleno = 1114 (0x45a), region = 48  ;;  %v1351_v3 = vpack.c.bf16 (!%p247_p2), %v301_v1, %v299_v0  ;;  %v300_v4 = vld [vmem:[%s1721_s1 + $0x10] sm:$0xff] (!%p247_p2)  ;;  %v303_v5 = vld [vmem:[%s1721_s1 + $0x28] sm:$0xff] (!%p247_p2)  ;;  %v305_v6 = vld [vmem:[%s1721_s1 + $0x38] sm:$0xff] (!%p247_p2)  ;;  %385 = vmatprep.mubr.f32.mxu0 (!%p247_p2), %v1435_v7  ;;  %vm411_vm1 = vcmask (!%p247_p2), 130048   ;;  %s1436_s20 = smov (!%p247_p2), 64  }
   0x7   : > { %v1353_v8 = vpack.c.bf16 (!%p247_p2), %v300_v4, %v298_v2  ;;  %v1355_v9 = vpack.c.bf16 (!%p247_p2), %v305_v6, %v303_v5  ;;  %v302_v10 = vld [vmem:[%s1721_s1 + $0x20] sm:$0xff] (!%p247_p2)  ;;  %v304_v11 = vld [vmem:[%s1721_s1 + $0x30] sm:$0xff] (!%p247_p2)  ;;  %v307_v12 = vld [vmem:[%s1721_s1 + $0x48] sm:$0xff] (!%p247_p2)  ;;  %v1437_v43 = vmov (!%p247_p2), 0.0|0.0   ;;  %vm1438_vm2 = vmmov (!%p247_p2), 0   ;;  %s1439_s13 = smov (!%p247_p2), 96  }
   0x8   : > { %1352 = vmatprep.subr.bf16.mxu0 (!%p247_p2), %v1351_v3  ;;  %v309_v13 = vld [vmem:[%s1721_s1 + $0x58] sm:$0xff] (!%p247_p2)  ;;  %v1357_v14 = vpack.c.bf16 (!%p247_p2), %v304_v11, %v302_v10  ;;  %v306_v16 = vld [vmem:[%s1721_s1 + $0x40] sm:$0xff] (!%p247_p2)  ;;  %v308_v17 = vld [vmem:[%s1721_s1 + $0x50] sm:$0xff] (!%p247_p2)  ;;  %vm753_vm3 = vcmask (!%p247_p2), 64512   ;;  %s1440_s27 = smov (!%p247_p2), 4   ;;  %s1441_s28 = smov (!%p247_p2), 124  }
   0x9   : > { %1354 = vmatpush1.bf16.msra.mxu0 (!%p247_p2), %v1353_v8  ;;  %v1359_v15 = vpack.c.bf16 (!%p247_p2), %v309_v13, %v307_v12  ;;  %v311_v18 = vld [vmem:[%s1721_s1 + $0x68] sm:$0xff] (!%p247_p2)  ;;  %v313_v19 = vld [vmem:[%s1721_s1 + $0x78] sm:$0xff] (!%p247_p2)  ;;  %v1361_v20 = vpack.c.bf16 (!%p247_p2), %v308_v17, %v306_v16  ;;  %v310_v22 = vld [vmem:[%s1721_s1 + $0x60] sm:$0xff] (!%p247_p2)  ;;  %s1442_s29 = smov (!%p247_p2), 8   ;;  %s1444_s8 = smov (!%p247_p2), 16   ;;  %vm1061_vm4 = vcmask (!%p247_p2), 31744  }
   0xa   : > { %1356 = vmatprep.subr.bf16.mxu0 (!%p247_p2), %v1355_v9  ;;  %v1363_v21 = vpack.c.bf16 (!%p247_p2), %v313_v19, %v311_v18  ;;  %v312_v23 = vld [vmem:[%s1721_s1 + $0x70] sm:$0xff] (!%p247_p2)  ;;  %v1240_v39 = vld [vmem:[%s1722_s2 + $0x18] sm:$0xff] (!%p247_p2)  ;;  %v398_v40 = vld [vmem:[%s1722_s2] sm:$0xff] (!%p247_p2)  ;;  %s1445_s9 = smov (!%p247_p2), 20   ;;  %s1447_s11 = smov (!%p247_p2), 28   ;;  %vm1066_vm5 = vcmask (!%p247_p2), 97280  }
   0xb   : > { %v1365_v24 = vpack.c.bf16 (!%p247_p2), %v312_v23, %v310_v22  ;;  %v1239_v28 = vld [vmem:[%s1722_s2 + $0x10] sm:$0xff] (!%p247_p2)  ;;  %v399_v41 = vld [vmem:[%s1722_s2 + $0x8] sm:$0xff] (!%p247_p2)  ;;  %v1245_v42 = vld [vmem:[%s1722_s2 + $0x20] sm:$0xff] (!%p247_p2)  ;;  %s1448_s12 = smov (!%p247_p2), 32   ;;  %vm1071_vm6 = vcmask (!%p247_p2), 162816   ;;  %vm1074_vm7 = vcmask (!%p247_p2), 195584  }
   0xc   : > { %1300 = vmatprep.mubr.msk.f32.mxu1 (!%p247_p2), %vm411_vm1, %v1239_v28  ;;  %v663_v44 = vld [vmem:[%s1724_s4] sm:$0xff] (!%p247_p2)  ;;  %v664_v45 = vld [vmem:[%s1724_s4 + $0x8] sm:$0xff] (!%p247_p2)  ;;  %v665_v48 = vld [vmem:[%s1724_s4 + $0x10] sm:$0xff] (!%p247_p2)  ;;  %vm1077_vm8 = vcmask (!%p247_p2), 228352   ;;  %vm1080_vm9 = vcmask (!%p247_p2), 261120   ;;  %vm1083_vm10 = vcmask (!%p247_p2), 293888  }
   0xd   : > { %s1729_s25 = smov (!%p282_p3, %s1227_s25), 1  ;;  %1358 = vmatpush1.bf16.msra.mxu0 %v1357_v14  ;;  %v1246_v46 = vld [vmem:[%s1722_s2 + $0x28] sm:$0xff]  ;;  %v1380_v47 = vpack.c.bf16 %v664_v45, %v663_v44  ;;  %v666_v49 = vld [vmem:[%s1724_s4 + $0x18] sm:$0xff]  ;;  %v667_v51 = vld [vmem:[%s1724_s4 + $0x20] sm:$0xff]  ;;  %vm1086_vm11 = vcmask 326656   ;;  %vm1089_vm12 = vcmask 359424  }
   0xe   : > { %1360 = vmatprep.subr.bf16.mxu0 %v1359_v15  ;;  %s1264_s14 = sshll.u32 %s1729_s25, 4  ;;  %v1383_v50 = vpack.c.bf16 %v666_v49, %v665_v48  ;;  %v668_v52 = vld [vmem:[%s1724_s4 + $0x28] sm:$0xff]  ;;  %v669_v54 = vld [vmem:[%s1724_s4 + $0x30] sm:$0xff]  ;;  %v670_v55 = vld [vmem:[%s1724_s4 + $0x38] sm:$0xff]  ;;  %s1234_s30 = sshll.u32 %s1729_s25, 3  ;;  %vm1092_vm13 = vcmask 392192  }
   0xf   : > { %s286_s17 = scalar_lea.vmem %s1720_s0, %s1264_s14  ;;  %v1386_v53 = vpack.c.bf16 %v668_v52, %v667_v51  ;;  %v1389_v56 = vpack.c.bf16 %v670_v55, %v669_v54  ;;  %s290_s10 = scalar_lea.vmem %s1723_s3, %s1234_s30  ;;  %v1250_v60 = vld [vmem:[%s1725_s5 + $0x10] sm:$0xff]  ;;  %v1251_v0 = vld [vmem:[%s1725_s5 + $0x18] sm:$0xff]  ;;  %v744_v1 = vld [vmem:[%s1725_s5] sm:$0xff]  ;;  %vm1095_vm14 = vcmask 424960   ;;  %vm1098_vm15 = vcmask 457728  }
  0x10   : > { %v296_v25 = vld [vmem:[%s286_s17] sm:$0xff]  ;;  %v297_v26 = vld [vmem:[%s286_s17 + $0x8] sm:$0xff]  ;;  %s1443_s30 = smov 12   ;;  %s295_s21 = scalar_lea.vmem %s1727_s7, %s1264_s14 }
  0x11   : > { %1362 = vmatpush1.bf16.msra.mxu0 %v1361_v20  ;;  %v662_v57 = vld [vmem:[%s290_s10] sm:$0xff]  ;;  %v745_v3 = vld [vmem:[%s1725_s5 + $0x8] sm:$0xff]  ;;  %s1446_s10 = smov 24  }
  0x12   : > { %1364 = vmatprep.subr.bf16.mxu0 %v1363_v21  ;;  %v1256_v4 = vld [vmem:[%s1725_s5 + $0x20] sm:$0xff]  ;;  %v1257_v5 = vld [vmem:[%s1725_s5 + $0x28] sm:$0xff] }
  0x15   : > { %1366 = vmatpush1.bf16.msra.mxu0 %v1365_v24 }
  0x18   : > { %1237 = vmatmul.mubr.msk.f32.vlgmr.msra.gmra.mrb[0].mxu0 %vm314_vm0, %v296_v25 }
  0x19   : > { %391 = vmatprep.mubr.f32.mxu0 %v1435_v7 }
  0x1c   : > { %1238 = vmatmul.mubr.msk.f32.gmra.mrb[2].mxu0 %vm314_vm0, %v297_v26 }
  0x1d   : > { %1338 = vmatprep.mubr.msk.f32.mxu0 %vm753_vm3, %v1250_v60 }
  0xeb   : > { %v387_v27 = vpop.f32.mrb[0].mxu0 }
  0xec   : > { %v389_v29 = vpop.f32.mrb[1].mxu0 }
  0xef   : > { %v393_v30 = vpop.f32.mrb[2].mxu0 }
  0xf0   : > { %v1371_v31 = vpack.c.bf16 %v393_v30, %v387_v27  ;;  %v395_v32 = vpop.f32.mrb[3].mxu0  ;;  %v1422_v33 = vpack.i.bf16 %v393_v30, %v387_v27 }
  0xf1   : > { %v1375_v34 = vpack.c.bf16 %v395_v32, %v389_v29 }
  0xf2   : > { %1423 = vrot.lane.b32.xlu0 %v1422_v33, %s1436_s20 }
 0x164   : > { %v1424_v35 = vpop.permute.xlu0 %1423 }
 0x165   : > { %v1426_v36 = vunpack.i.h.bf16 %v1424_v35  ;;  %v1425_v37 = vunpack.i.l.bf16 %v1424_v35 }
 0x167   : > { %v1367_v38 = vpack.c.bf16 %v1426_v36, %v1425_v37 }
 0x169   : > { %1368 = vmatprep.subr.bf16.mxu1 %v1367_v38 }
 0x16a   : > { %1370 = vmatpush3.bf16.msra.mxu1 %v1367_v38 }
 0x16b   : > { %1372 = vmatprep.subr.bf16.mxu1 %v1371_v31 }
 0x16d   : > { %1301 = vmatmul.mubr.msk.f32.vlgmr.msra.gmra.mrb[0].mxu1 %vm411_vm1, %v1240_v39 }
 0x16e   : > { %1374 = vmatpush3.bf16.msra.mxu1 %v1371_v31  ;;  %1307 = vmatprep.mubr.msk.f32.mxu1 %vm411_vm1, %v398_v40 }
 0x16f   : > { %1376 = vmatprep.subr.bf16.mxu1 %v1375_v34 }
 0x175   : > { %1308 = vmatmul.mubr.msk.f32.vlgmr.msra.gmra.mrb[0].mxu1 %vm411_vm1, %v399_v41 }
 0x176   : > { %1378 = vmatpush3.bf16.msra.mxu1 %v1375_v34  ;;  %1314 = vmatprep.mubr.msk.f32.mxu1 %vm411_vm1, %v1245_v42 }
 0x177   : > { %1379 = vmatprep.subr.bf16.mxu1 %v1437_v43 }
 0x17d   : > { %1315 = vmatmul.mubr.msk.f32.vlgmr.msra.gmra.mrb[0].mxu1 %vm411_vm1, %v1246_v46 }
 0x17e   : > { %1381 = vmatpush3.bf16.msra.mxu1 %v1380_v47  ;;  %1333 = vmatprep.mubr.msk.f32.mxu1 %vm1438_vm2, %v1435_v7 }
 0x17f   : > { %1382 = vmatprep.subr.bf16.mxu1 %v1437_v43 }
 0x182   : > { %1384 = vmatpush3.bf16.msra.mxu1 %v1383_v50 }
 0x183   : > { %1385 = vmatprep.subr.bf16.mxu1 %v1437_v43 }
 0x186   : > { %1387 = vmatpush3.bf16.msra.mxu1 %v1386_v53 }
 0x187   : > { %1388 = vmatprep.subr.bf16.mxu1 %v1437_v43 }
 0x18a   : > { %1390 = vmatpush3.bf16.msra.mxu1 %v1389_v56 }
 0x18d   : > { %1334 = vmatmul.mubr.msk.f32.vlgmr.msra.gmra.mrb[2].mxu1 %vm314_vm0, %v662_v57 }
 0x250   : > { %v1617_v58 = vpop.f32.mrb[0].mxu1 }
 0x251   : > { %v1619_v59 = vpop.f32.mrb[1].mxu1 }
 0x260   : > { %v740_v61 = vpop.f32.mrb[2].mxu1 }
 0x261   : > { %919 = vrot.lane.b32.xlu1 %v740_v61, %s1436_s20  ;;  %750 = vrot.lane.b32.xlu0 %v740_v61, %s1439_s13  ;;  %v1335_v62 = vpop.f32.mrb[3].mxu1  ;;  %s1449_s13 = smov 36  }
 0x2d3   : > { %v751_v63 = vpop.permute.xlu0 %750  ;;  %v920_v2 = vpop.permute.xlu1 %919 }
 0x2d4   : > { %1336 = vmatprep.subr.mxu0 %v751_v63 }
 0x2d5   : > { %1337 = vmatpush3.msra.mxu0 %v751_v63 }
 0x2d6   : > { %1339 = vmatmul.mubr.msk.f32.vlgmr.msra.gmra.mrb[4].mxu0 %vm753_vm3, %v1251_v0  ;;  %1341 = vmatprep.subr.mxu0 %v740_v61 }
 0x2d7   : > { %1342 = vmatpush3.msra.mxu0 %v740_v61  ;;  %1343 = vmatprep.mubr.msk.f32.mxu0 %vm753_vm3, %v744_v1 }
 0x2d8   : > { %1346 = vmatprep.subr.mxu0 %v920_v2 }
 0x2de   : > { %1344 = vmatmul.mubr.msk.f32.vlgmr.msra.gmra.mrb[4].mxu0 %vm753_vm3, %v745_v3 }
 0x2df   : > { %1347 = vmatpush3.msra.mxu0 %v920_v2  ;;  %1348 = vmatprep.mubr.msk.f32.mxu0 %vm753_vm3, %v1256_v4 }
 0x2e6   : > { %1349 = vmatmul.mubr.msk.f32.vlgmr.msra.gmra.mrb[4].mxu0 %vm753_vm3, %v1257_v5 }
 0x3b9   : > { %v1350_v6 = vpop.f32.mrb[4].mxu0 }
 0x3ba   : > { %1009 = vrot.lane.b32.xlu0 %v1350_v6, %s1440_s27  ;;  %v994_v7 = vpop.f32.mrb[5].mxu0 }
 0x3bb   : > { %1007 = vrot.lane.b32.xlu1 %v994_v7, %s1440_s27 }
 0x3be   : > { %1106 = vrot.lane.b32.xlu0 %v1350_v6, %s1441_s28 }
 0x3bf   : > { %1104 = vrot.lane.b32.xlu1 %v994_v7, %s1441_s28 }
 0x3c2   : > { %1015 = vrot.lane.b32.xlu0 %v1350_v6, %s1442_s29 }
 0x3c3   : > { %1013 = vrot.lane.b32.xlu1 %v994_v7, %s1442_s29 }
 0x3c6   : > { %1021 = vrot.lane.b32.xlu0 %v1350_v6, %s1443_s30 }
 0x3c7   : > { %1019 = vrot.lane.b32.xlu1 %v994_v7, %s1443_s30 }
 0x3ca   : > { %1027 = vrot.lane.b32.xlu0 %v1350_v6, %s1444_s8 }
 0x3cb   : > { %1025 = vrot.lane.b32.xlu1 %v994_v7, %s1444_s8 }
 0x3ce   : > { %1033 = vrot.lane.b32.xlu0 %v1350_v6, %s1445_s9 }
 0x3cf   : > { %1031 = vrot.lane.b32.xlu1 %v994_v7, %s1445_s9 }
 0x3d2   : > { %1039 = vrot.lane.b32.xlu0 %v1350_v6, %s1446_s10 }
 0x3d3   : > { %1037 = vrot.lane.b32.xlu1 %v994_v7, %s1446_s10 }
 0x3d6   : > { %1045 = vrot.lane.b32.xlu0 %v1350_v6, %s1447_s11 }
 0x3d7   : > { %1043 = vrot.lane.b32.xlu1 %v994_v7, %s1447_s11 }
 0x3da   : > { %1051 = vrot.lane.b32.xlu0 %v1350_v6, %s1448_s12 }
 0x3db   : > { %1049 = vrot.lane.b32.xlu1 %v994_v7, %s1448_s12 }
 0x3de   : > { %1057 = vrot.lane.b32.xlu0 %v1350_v6, %s1449_s13 }
 0x3df   : > { %1055 = vrot.lane.b32.xlu1 %v994_v7, %s1449_s13 }
 0x42c   : > { %v1010_v8 = vpop.permute.xlu0 %1009 }
 0x42d   : > { %v1008_v9 = vpop.permute.xlu1 %1007  ;;  %v1063_v18 = vsel %vm1061_vm4, %v1350_v6, %v1010_v8 }
 0x42e   : > { %v1062_v20 = vsel %vm1061_vm4, %v994_v7, %v1008_v9 }
 0x430   : > { %v1107_v10 = vpop.permute.xlu0 %1106 }
 0x431   : > { %v1111_v11 = vsel %vm1061_vm4, %v1107_v10, %v1350_v6  ;;  %v1105_v12 = vpop.permute.xlu1 %1104 }
 0x432   : > { %v1110_v13 = vsel %vm1061_vm4, %v1105_v12, %v994_v7  ;;  %v1113_v14 = vsel %vm753_vm3, %v1111_v11, %v1010_v8 }
 0x433   : > { %v1112_v16 = vsel %vm753_vm3, %v1110_v13, %v1008_v9  ;;  %v1115_v19 = vsel %vm1066_vm5, %v1113_v14, %v1010_v8 }
 0x434   : > { %v1016_v15 = vpop.permute.xlu0 %1015  ;;  %v1114_v21 = vsel %vm1066_vm5, %v1112_v16, %v1008_v9 }
 0x435   : > { %v1014_v17 = vpop.permute.xlu1 %1013  ;;  %v1065_v22 = vsel %vm753_vm3, %v1063_v18, %v1016_v15  ;;  %v1117_v26 = vsel %vm411_vm1, %v1115_v19, %v1016_v15  ;;  %v1260_v19 = vld [vmem:[%s1726_s6] ss:$0 sm:$0xff] }
 0x436   : > { %v1064_v24 = vsel %vm753_vm3, %v1062_v20, %v1014_v17  ;;  %v1068_v27 = vsel %vm1066_vm5, %v1065_v22, %v1016_v15  ;;  %v1116_v28 = vsel %vm411_vm1, %v1114_v21, %v1014_v17  ;;  %v1119_v32 = vsel %vm1071_vm6, %v1117_v26, %v1016_v15 }
 0x437   : > { %v1067_v29 = vsel %vm1066_vm5, %v1064_v24, %v1014_v17  ;;  %v1118_v35 = vsel %vm1071_vm6, %v1116_v28, %v1014_v17  ;;  %v1261_v17 = vld [vmem:[%s1726_s6 + $0x1] ss:$0 sm:$0xff] }
 0x438   : > { %v1022_v23 = vpop.permute.xlu0 %1021 }
 0x439   : > { %v1020_v25 = vpop.permute.xlu1 %1019  ;;  %v1070_v30 = vsel %vm411_vm1, %v1068_v27, %v1022_v23  ;;  %v1121_v36 = vsel %vm1074_vm7, %v1119_v32, %v1022_v23 }
 0x43a   : > { %v1069_v33 = vsel %vm411_vm1, %v1067_v29, %v1020_v25  ;;  %v1073_v37 = vsel %vm1071_vm6, %v1070_v30, %v1022_v23  ;;  %v1120_v38 = vsel %vm1074_vm7, %v1118_v35, %v1020_v25  ;;  %v1123_v42 = vsel %vm1077_vm8, %v1121_v36, %v1022_v23 }
 0x43b   : > { %v1072_v39 = vsel %vm1071_vm6, %v1069_v33, %v1020_v25  ;;  %v1122_v45 = vsel %vm1077_vm8, %v1120_v38, %v1020_v25  ;;  %vm1101_vm1 = vcmask 490496  }
 0x43c   : > { %v1028_v31 = vpop.permute.xlu0 %1027 }
 0x43d   : > { %v1026_v34 = vpop.permute.xlu1 %1025  ;;  %v1076_v40 = vsel %vm1074_vm7, %v1073_v37, %v1028_v31  ;;  %v1125_v46 = vsel %vm1080_vm9, %v1123_v42, %v1028_v31 }
 0x43e   : > { %v1075_v43 = vsel %vm1074_vm7, %v1072_v39, %v1026_v34  ;;  %v1079_v47 = vsel %vm1077_vm8, %v1076_v40, %v1028_v31  ;;  %v1124_v48 = vsel %vm1080_vm9, %v1122_v45, %v1026_v34  ;;  %v1127_v52 = vsel %vm1083_vm10, %v1125_v46, %v1028_v31 }
 0x43f   : > { %v1078_v49 = vsel %vm1077_vm8, %v1075_v43, %v1026_v34  ;;  %v1126_v55 = vsel %vm1083_vm10, %v1124_v48, %v1026_v34 }
 0x440   : > { %v1034_v41 = vpop.permute.xlu0 %1033 }
 0x441   : > { %v1032_v44 = vpop.permute.xlu1 %1031  ;;  %v1082_v50 = vsel %vm1080_vm9, %v1079_v47, %v1034_v41  ;;  %v1129_v56 = vsel %vm1086_vm11, %v1127_v52, %v1034_v41 }
 0x442   : > { %v1081_v53 = vsel %vm1080_vm9, %v1078_v49, %v1032_v44  ;;  %v1085_v57 = vsel %vm1083_vm10, %v1082_v50, %v1034_v41  ;;  %v1128_v60 = vsel %vm1086_vm11, %v1126_v55, %v1032_v44  ;;  %v1131_v0 = vsel %vm1089_vm12, %v1129_v56, %v1034_v41 }
 0x443   : > { %v1084_v61 = vsel %vm1083_vm10, %v1081_v53, %v1032_v44  ;;  %v1130_v3 = vsel %vm1089_vm12, %v1128_v60, %v1032_v44 }
 0x444   : > { %v1040_v51 = vpop.permute.xlu0 %1039 }
 0x445   : > { %v1038_v54 = vpop.permute.xlu1 %1037  ;;  %v1088_v62 = vsel %vm1086_vm11, %v1085_v57, %v1040_v51  ;;  %v1133_v4 = vsel %vm1092_vm13, %v1131_v0, %v1040_v51 }
 0x446   : > { %v1087_v1 = vsel %vm1086_vm11, %v1084_v61, %v1038_v54  ;;  %v1132_v5 = vsel %vm1092_vm13, %v1130_v3, %v1038_v54  ;;  %v1091_v6 = vsel %vm1089_vm12, %v1088_v62, %v1040_v51  ;;  %v1135_v10 = vsel %vm1095_vm14, %v1133_v4, %v1040_v51 }
 0x447   : > { %v1090_v8 = vsel %vm1089_vm12, %v1087_v1, %v1038_v54  ;;  %v1134_v14 = vsel %vm1095_vm14, %v1132_v5, %v1038_v54 }
 0x448   : > { %v1046_v63 = vpop.permute.xlu0 %1045 }
 0x449   : > { %v1044_v2 = vpop.permute.xlu1 %1043  ;;  %v1094_v7 = vsel %vm1092_vm13, %v1091_v6, %v1046_v63  ;;  %v1137_v13 = vsel %vm1098_vm15, %v1135_v10, %v1046_v63 }
 0x44a   : > { %v1093_v11 = vsel %vm1092_vm13, %v1090_v8, %v1044_v2  ;;  %v1097_v15 = vsel %vm1095_vm14, %v1094_v7, %v1046_v63  ;;  %v1136_v16 = vsel %vm1098_vm15, %v1134_v14, %v1044_v2 }
 0x44b   : > { %v1096_v20 = vsel %vm1095_vm14, %v1093_v11, %v1044_v2 }
 0x44c   : > { %v1052_v9 = vpop.permute.xlu0 %1051 }
 0x44d   : > { %v1050_v12 = vpop.permute.xlu1 %1049  ;;  %v1139_v18 = vsel %vm1101_vm1, %v1137_v13, %v1052_v9  ;;  %v1100_v21 = vsel %vm1098_vm15, %v1097_v15, %v1052_v9 }
 0x44e   : > { %v1138_v22 = vsel %vm1101_vm1, %v1136_v16, %v1050_v12  ;;  %v1099_v24 = vsel %vm1098_vm15, %v1096_v20, %v1050_v12  ;;  %v1153_v27 = vmul.f32 %v1261_v17, %v1139_v18 }
 0x44f   : > { %v1152_v30 = vmul.f32 %v1261_v17, %v1138_v22 }
 0x450   : > { %v1058_v23 = vpop.permute.xlu0 %1057 }
 0x451   : > { %v1103_v25 = vsel %vm1101_vm1, %v1100_v21, %v1058_v23  ;;  %v1056_v26 = vpop.permute.xlu1 %1055 }
 0x452   : > { %v1146_v28 = vmul.f32 %v1260_v19, %v1103_v25  ;;  %v1102_v29 = vsel %vm1101_vm1, %v1099_v24, %v1056_v26 }
 0x453   : > { %v1145_v31 = vmul.f32 %v1260_v19, %v1102_v29 }
 0x454   : > { %v1155_v32 = vadd.f32 %v1153_v27, %v1146_v28 }
 0x455   : > { %v1154_v33 = vadd.f32 %v1152_v30, %v1145_v31 }
 0x456   : > { %v1157_v34 = vadd.f32 %v1617_v58, %v1155_v32 }
 0x457   : > { %v1156_v35 = vadd.f32 %v1154_v33, %v1619_v59 }
 0x458   : > { %1159 = vst.msk [vmem:[%s295_s21 + $0x8] sm:$0xff] %vm314_vm0, %v1157_v34 }
 0x459   : > { %1158 = vst.msk [vmem:[%s295_s21] sm:$0xff] %vm314_vm0, %v1156_v35 }
 0x45a PF: > { %s17_s24 = sadd.s32 1, %s1433_s24  }
 0x45b   : > { %p14_p4 = scmp.ge.s32.totalorder %s17_s24, 4  }
 0x45d   :  { %16 = sbr.rel (!%p14_p4) target bundleno = 1 (0x1), region = 85 }

</bundles_post_ra>
